<compile_context>
chip_gen: v6e
topology: v6e:2x2x1
jax: 0.10.0
libtpu: 0.0.40
codegen_flags: <defaults>
</compile_context>

<pallas_src>
import jax
import jax.numpy as jnp
from jax.experimental import pallas as pl
from jax.experimental.pallas import tpu as pltpu


# ---------------------------------------------------------------------------
# Kernel bodies
# ---------------------------------------------------------------------------
def _noop_kernel(x_ref, o_ref):
    # Output aliases input (input_output_aliases={0: 0}): the aliased buffer
    # already holds x, so there is nothing to compute and nothing to move.
    # `touch` just pins a read/write dependency on the aliased output so the
    # (otherwise empty) custom call keeps a well-defined ordering.
    if hasattr(pltpu, "touch"):
        pltpu.touch(o_ref)
    # (an empty body is also legal here -- the alias supplies the data)


def _dma_copy_kernel(x_hbm, o_hbm, sem):
    # One HBM -> HBM DMA: no VMEM staging, no vld/vst or vreg pressure, no
    # (8,128) / lane-divisibility constraints; runs at HBM/DMA roofline.
    cp = pltpu.make_async_copy(x_hbm, o_hbm, sem)
    cp.start()
    cp.wait()


# ---------------------------------------------------------------------------
# Wrappers
# ---------------------------------------------------------------------------
def identity_passthrough(x):
    """The semantically exact (and truly optimal) Identity: no op at all."""
    return x


def identity_copy(x):
    """Identity that materialises a fresh output buffer via a single
    HBM->HBM DMA (for callers that cannot alias/donate x)."""
    nbytes = x.size * x.dtype.itemsize
    return pl.pallas_call(
        _dma_copy_kernel,
        out_shape=jax.ShapeDtypeStruct(x.shape, x.dtype),
        in_specs=[pl.BlockSpec(memory_space=pl.ANY)],
        out_specs=pl.BlockSpec(memory_space=pl.ANY),
        scratch_shapes=[pltpu.SemaphoreType.DMA],
        cost_estimate=pl.CostEstimate(
            flops=0, transcendentals=0, bytes_accessed=2 * nbytes
        ),
    )(x)


def identity(x):
    """Pallas TPU implementation of Identity.forward (returns x unchanged).

    No grid, no tiling, no VMEM: the output aliases the input and the kernel
    body is a no-op.  NOTE: to actually avoid the one defensive HBM copy XLA
    inserts for the alias, the caller should donate x
    (e.g. jax.jit(identity, donate_argnums=0)); x must then not be reused.
    """
    try:
        return pl.pallas_call(
            _noop_kernel,
            out_shape=jax.ShapeDtypeStruct(x.shape, x.dtype),
            in_specs=[pl.BlockSpec(memory_space=pl.ANY)],
            out_specs=pl.BlockSpec(memory_space=pl.ANY),
            input_output_aliases={0: 0},
            cost_estimate=pl.CostEstimate(
                flops=0, transcendentals=0, bytes_accessed=0
            ),
        )(x)
    except Exception:
        # Robust, shape-agnostic fallback: single HBM->HBM DMA copy.
        return identity_copy(x)


# ---------------------------------------------------------------------------
# Self-test
# ---------------------------------------------------------------------------
if __name__ == "__main__":
    key = jax.random.PRNGKey(0)
    x = jax.random.normal(key, (2, 4, 16, 16), dtype=jnp.float32)

    # Primary (aliased no-op) path.
    y = identity(x)
    jax.block_until_ready(y)
    assert y.shape == x.shape and y.dtype == x.dtype
    assert bool(jnp.array_equal(y, x))

    # Explicit fresh-copy path (single HBM->HBM DMA).
    y2 = identity_copy(x)
    jax.block_until_ready(y2)
    assert y2.shape == x.shape and y2.dtype == x.dtype
    assert bool(jnp.array_equal(y2, x))

    # Non-128-divisible / odd shape: both paths are shape-agnostic now.
    x_odd = jax.random.normal(jax.random.PRNGKey(0), (3, 5, 7), dtype=jnp.float32)
    y3 = identity(x_odd)
    jax.block_until_ready(y3)
    assert bool(jnp.array_equal(y3, x_odd))

    print("KERNEL_OK")
</pallas_src>

<mosaic_0001>
module attributes {stable_mosaic.version = 11 : i64} {
  func.func @_noop_kernel(%arg0: memref<2x4x16x16xf32, #tpu.memory_space<any>>, %arg1: memref<2x4x16x16xf32, #tpu.memory_space<any>>) attributes {dimension_semantics = [], scalar_prefetch = 0 : i64, scratch_operands = 0 : i64, tpu.core_type = #tpu.core_type<tc>} {
    return
  }
}

module attributes {stable_mosaic.version = 11 : i64} {
  func.func @_dma_copy_kernel(%arg0: memref<2x4x16x16xf32, #tpu.memory_space<any>>, %arg1: memref<2x4x16x16xf32, #tpu.memory_space<any>>, %arg2: memref<!tpu.dma_semaphore, #tpu.memory_space<semaphore_mem>>) attributes {dimension_semantics = [], scalar_prefetch = 0 : i64, scratch_operands = 1 : i64, tpu.core_type = #tpu.core_type<tc>} {
    tpu.enqueue_dma source(%arg0 : memref<2x4x16x16xf32, #tpu.memory_space<any>>) target(%arg1 : memref<2x4x16x16xf32, #tpu.memory_space<any>>) target_semaphore(%arg2 : memref<!tpu.dma_semaphore, #tpu.memory_space<semaphore_mem>>)
    tpu.wait_dma2 semaphore(%arg2 : memref<!tpu.dma_semaphore, #tpu.memory_space<semaphore_mem>>) src(%arg0 : memref<2x4x16x16xf32, #tpu.memory_space<any>>) dst(%arg1 : memref<2x4x16x16xf32, #tpu.memory_space<any>>)
    return
  }
}

</mosaic_0001>

<bundles_post_ra>
// kernel: tpu_custom_call.1
= control target key start
LH: loop header
LB: loop body
LE: loop exit
PB: predicated region body
PF: predicated region fallthrough
CT: control target
= control target key end

     0   :  { %s16_s0 = inlined_call_operand.hbm [shape: f32[2,4,16,16], index: 0, kind: input, shape index: {}, may-alias: {0,1}]   ;;  %s17_s1 = inlined_call_operand.hbm [shape: f32[2,4,16,16], index: 1, kind: output, shape index: {}, may-alias: {0,1}]  }

// kernel: tpu_custom_call.1
= control target key start
LH: loop header
LB: loop body
LE: loop exit
PB: predicated region body
PF: predicated region fallthrough
CT: control target
= control target key end

     0   :  { %s30_s6 = smov [#allocation2]   ;;  %s31_s7 = smov 131072   ;;  %s49_s0 = inlined_call_operand.hbm [shape: f32[2,4,16,16], index: 0, kind: input, shape index: {}]   ;;  %s50_s1 = inlined_call_operand.hbm [shape: f32[2,4,16,16], index: 1, kind: output, shape index: {}]  }
   0x1   :  { %s32_s8 = smov 0  }
   0x2   :  { %12 = dma.general %s49_s0, 2048, %s50_s1, %s30_s6, %s31_s7, [#allocation4], %s32_s8, 0  }
   0x3   :  { %28 = dma.done.wait [#allocation2], 2048 }
   0x4   :  { %29 = vsyncadd [#allocation2], 4294965248 }
   0x5   :  { %18 = vsyncmov [#allocation2] }
   0x8   :  { %s19_s13 = vpop.sfrf %18 }
   0x9   :  { %p24_p0 = scmp.ne.s32.totalorder %s19_s13, 0 }
   0xb   :  { %23 = shalt.err (%p24_p0)  }

</bundles_post_ra>
